<compile_context>
chip_gen: v7x
topology: tpu7x:2x2x1
jax: 0.10.0
libtpu: 0.0.40
codegen_flags: <defaults>
</compile_context>

<pallas_src>
import functools

import jax
import jax.numpy as jnp
from jax.experimental import pallas as pl
from jax.experimental.pallas import tpu as pltpu


def _round_up(x, m):
    return ((x + m - 1) // m) * m


def _vmem_capacity_bytes():
    """Per-core VMEM capacity; conservative default if the query fails."""
    try:
        info = pltpu.get_tpu_info()
        cap = int(getattr(info, "vmem_capacity_bytes", 0))
        if cap > 0:
            return cap
    except Exception:
        pass
    return 64 * 1024 * 1024  # v7x per-TC size: safe lower bound everywhere


def _choose_th(h_pad):
    """Hidden-dim chunk (resident path): keep (TM, TH) live intermediate modest.

    h_pad is always a multiple of 128, so the 128 divisor always exists (no
    silent full-H fallback anymore).
    """
    if h_pad <= 2048:
        return h_pad
    for th in (2048, 1024, 512, 256, 128):
        if h_pad % th == 0:
            return th
    return 128


def _choose_streamed_th(h_pad, c_pad, wbytes, budget):
    """Hidden-dim chunk (streamed path): per-chunk weights double-buffered."""
    for th in (2048, 1024, 512, 256, 128):
        if h_pad % th == 0 and 4 * c_pad * th * wbytes <= budget // 3:
            return th
    return 128


def _choose_tm(m, row_bytes, fixed_bytes, budget):
    """Largest M tile that amortizes per-grid-step overhead and fits VMEM."""
    if m < 128:
        # bf16 packs 16 sublanes per vreg -> round tiny M to a multiple of 16.
        return max(16, _round_up(m, 16))
    cap = _round_up(m, 128)
    for tm in (1024, 512, 256, 128):
        if tm > cap:
            continue
        if fixed_bytes + tm * row_bytes <= budget:
            return tm
    return 128


# --------------------------------------------------------------------------
# Kernels
# --------------------------------------------------------------------------
def _mlp_resident_kernel(x_ref, w1_ref, w2_ref, o_ref, *, th, n_chunks,
                         compute_dtype):
    """o = silu(x @ w1) @ w2 with VMEM-resident weights, H chunked by `th`."""
    # Cast rides the tile that is already DMA'd into VMEM.
    x = x_ref[...].astype(compute_dtype)                          # (TM, C_pad)

    def h_chunk(j):
        w1c = w1_ref[:, j * th:(j + 1) * th]                      # (C_pad, TH)
        h = jnp.dot(x, w1c, preferred_element_type=jnp.float32)   # (TM, TH) f32
        # SiLU: EUP exp + approximate reciprocal (vrcp) instead of a divide.
        h = h * pl.reciprocal(1.0 + jnp.exp(-h), approx=True)
        w2c = w2_ref[j * th:(j + 1) * th, :]                      # (TH, C_pad)
        return jnp.dot(h.astype(compute_dtype), w2c,
                       preferred_element_type=jnp.float32)        # (TM, C_pad)

    # Loop-carried f32 accumulator: no scratch round-trips, no zero-init.
    acc = h_chunk(0)
    for j in range(1, n_chunks):
        acc = acc + h_chunk(j)

    # TODO(synk): dropout is identity in eval mode; training-mode dropout
    # (pltpu.prng_random_bits + mask/scale) not emitted here.
    o_ref[...] = acc.astype(o_ref.dtype)


def _mlp_streamed_kernel(x_ref, w1_ref, w2_ref, o_ref, acc_ref, *,
                         compute_dtype):
    """Streamed-weights path: grid=(M tiles, H chunks), H trailing/arbitrary."""
    k = pl.program_id(1)

    @pl.when(k == 0)
    def _():
        acc_ref[...] = jnp.zeros_like(acc_ref)

    x = x_ref[...].astype(compute_dtype)                          # (TM, C_pad)
    h = jnp.dot(x, w1_ref[...], preferred_element_type=jnp.float32)
    h = h * pl.reciprocal(1.0 + jnp.exp(-h), approx=True)
    acc_ref[...] += jnp.dot(h.astype(compute_dtype), w2_ref[...],
                            preferred_element_type=jnp.float32)

    @pl.when(k == pl.num_programs(1) - 1)
    def _():
        o_ref[...] = acc_ref[...].astype(o_ref.dtype)


# --------------------------------------------------------------------------
# pallas_call wrappers
# --------------------------------------------------------------------------
def _resident_call(x2d, w1_t, w2_t, *, tm, th, out_dtype, compute_dtype,
                   vmem_limit, cost, single_buffer_weights):
    m_pad, c_pad = x2d.shape
    h_pad = w1_t.shape[1]
    n_chunks = h_pad // th
    kernel = functools.partial(_mlp_resident_kernel, th=th, n_chunks=n_chunks,
                               compute_dtype=compute_dtype)

    if single_buffer_weights:
        # Constant index_map -> weights are DMA'd once; no need for 2 buffers.
        w1_spec = pl.BlockSpec((c_pad, h_pad), lambda i: (0, 0),
                               pipeline_mode=pl.Buffered(1))
        w2_spec = pl.BlockSpec((h_pad, c_pad), lambda i: (0, 0),
                               pipeline_mode=pl.Buffered(1))
    else:
        w1_spec = pl.BlockSpec((c_pad, h_pad), lambda i: (0, 0))
        w2_spec = pl.BlockSpec((h_pad, c_pad), lambda i: (0, 0))

    return pl.pallas_call(
        kernel,
        out_shape=jax.ShapeDtypeStruct((m_pad, c_pad), out_dtype),
        grid=(m_pad // tm,),
        in_specs=[
            pl.BlockSpec((tm, c_pad), lambda i: (i, 0)),  # x tile, double-buffered
            w1_spec,                                      # resident across M tiles
            w2_spec,
        ],
        out_specs=pl.BlockSpec((tm, c_pad), lambda i: (i, 0)),
        compiler_params=pltpu.CompilerParams(
            dimension_semantics=("parallel",),
            vmem_limit_bytes=vmem_limit,
        ),
        cost_estimate=cost,
    )(x2d, w1_t, w2_t)


def _streamed_call(x2d, w1_t, w2_t, *, tm, th, out_dtype, compute_dtype,
                   vmem_limit, cost):
    m_pad, c_pad = x2d.shape
    h_pad = w1_t.shape[1]
    kernel = functools.partial(_mlp_streamed_kernel, compute_dtype=compute_dtype)
    return pl.pallas_call(
        kernel,
        out_shape=jax.ShapeDtypeStruct((m_pad, c_pad), out_dtype),
        grid=(m_pad // tm, h_pad // th),
        in_specs=[
            pl.BlockSpec((tm, c_pad), lambda i, k: (i, 0)),
            pl.BlockSpec((c_pad, th), lambda i, k: (0, k)),
            pl.BlockSpec((th, c_pad), lambda i, k: (k, 0)),
        ],
        out_specs=pl.BlockSpec((tm, c_pad), lambda i, k: (i, 0)),
        scratch_shapes=[pltpu.VMEM((tm, c_pad), jnp.float32)],
        compiler_params=pltpu.CompilerParams(
            dimension_semantics=("parallel", "arbitrary"),
            vmem_limit_bytes=vmem_limit,
        ),
        cost_estimate=cost,
    )(x2d, w1_t, w2_t)


# --------------------------------------------------------------------------
# Public API
# --------------------------------------------------------------------------
def prepare_mlp_params(w1, w2, *, compute_dtype=jnp.bfloat16):
    """One-time weight prep, hoisted out of the per-call path.

    w1: (H, C) = nn.Linear(C, 4C, bias=False).weight (PyTorch layout)
    w2: (C, H) = nn.Linear(4C, C, bias=False).weight
    Returns (w1_t, w2_t) in compute_dtype with shapes (C_pad, H_pad),
    (H_pad, C_pad); zero-padded so both dims are multiples of 128 (lane-dense,
    zeros do not change the result).
    """
    H, C = w1.shape
    assert w2.shape == (C, H), (w1.shape, w2.shape)
    c_pad = _round_up(C, 128)
    h_pad = _round_up(H, 128)
    w1_t = jnp.pad(w1.T.astype(compute_dtype), ((0, c_pad - C), (0, h_pad - H)))
    w2_t = jnp.pad(w2.T.astype(compute_dtype), ((0, h_pad - H), (0, c_pad - C)))
    return w1_t, w2_t


def mlp_forward(x, w1_t, w2_t, *, compute_dtype=jnp.bfloat16, tm=None, th=None):
    """Neo MLP forward.  x: (B, T, C); weights from prepare_mlp_params."""
    B, T, C = x.shape
    c_pad, h_pad = w1_t.shape
    assert w2_t.shape == (h_pad, c_pad), (w1_t.shape, w2_t.shape)
    M = B * T
    out_dtype = x.dtype

    xbytes = jnp.dtype(x.dtype).itemsize
    obytes = jnp.dtype(out_dtype).itemsize
    wbytes = jnp.dtype(w1_t.dtype).itemsize

    x2d = x.reshape(M, C)
    if c_pad != C:
        # Only triggers for C not a multiple of 128 (tiny configs like Neo's
        # C=32); makes the output lane-dense (unmasked vst).
        x2d = jnp.pad(x2d, ((0, 0), (0, c_pad - C)))

    vmem_cap = _vmem_capacity_bytes()
    vmem_limit = int(0.85 * vmem_cap)      # generation-aware, compiler headroom
    budget = int(0.80 * vmem_limit)

    weight_bytes = 2 * c_pad * h_pad * wbytes   # both weights, single-buffered
    use_streamed = weight_bytes > budget // 2

    cost = pl.CostEstimate(
        flops=4 * M * c_pad * h_pad,            # two (M, C, H) matmuls
        transcendentals=M * h_pad,              # exp in SiLU
        bytes_accessed=M * c_pad * (xbytes + obytes) + weight_bytes,
    )

    if not use_streamed:
        if th is None:
            th = _choose_th(h_pad)
        row_bytes = (2 * c_pad * xbytes + 2 * c_pad * obytes
                     + th * (4 + wbytes) + c_pad * 4)
        if tm is None:
            tm = _choose_tm(M, row_bytes, weight_bytes, budget)
        m_pad = _round_up(M, tm)
        if m_pad != M:
            x2d = jnp.pad(x2d, ((0, m_pad - M), (0, 0)))
        try:
            out = _resident_call(x2d, w1_t, w2_t, tm=tm, th=th,
                                 out_dtype=out_dtype, compute_dtype=compute_dtype,
                                 vmem_limit=vmem_limit, cost=cost,
                                 single_buffer_weights=True)
        except Exception:
            # pipeline_mode=pl.Buffered(1) unavailable/rejected on this jax
            # build: fall back to default (double-buffered) resident weights.
            out = _resident_call(x2d, w1_t, w2_t, tm=tm, th=th,
                                 out_dtype=out_dtype, compute_dtype=compute_dtype,
                                 vmem_limit=vmem_limit, cost=cost,
                                 single_buffer_weights=False)
    else:
        # Weights too large to keep resident (e.g. v7x 64 MiB VMEM at big C*H):
        # stream (C_pad, TH) / (TH, C_pad) chunks behind the MXU work.
        if th is None:
            th = _choose_streamed_th(h_pad, c_pad, wbytes, budget)
        row_bytes = (2 * c_pad * xbytes + 2 * c_pad * obytes
                     + th * (4 + wbytes) + c_pad * 4)
        fixed_bytes = 4 * c_pad * th * wbytes   # per-chunk w1+w2, double-buffered
        if tm is None:
            tm = _choose_tm(M, row_bytes, fixed_bytes, budget)
        m_pad = _round_up(M, tm)
        if m_pad != M:
            x2d = jnp.pad(x2d, ((0, m_pad - M), (0, 0)))
        out = _streamed_call(x2d, w1_t, w2_t, tm=tm, th=th,
                             out_dtype=out_dtype, compute_dtype=compute_dtype,
                             vmem_limit=vmem_limit, cost=cost)

    if m_pad != M or c_pad != C:
        out = out[:M, :C]
    return out.reshape(B, T, C)


if __name__ == "__main__":
    # Neo config slice: n_embd=32, hidden=4*n_embd, dropout=0.0 (eval), float32.
    n_embd = 32
    hidden = 4 * n_embd
    B, T = 2, 8
    dtype = jnp.float32

    key = jax.random.PRNGKey(0)
    kx, kw1, kw2 = jax.random.split(key, 3)

    x = jax.random.normal(kx, (B, T, n_embd), dtype=dtype)
    # nn.Linear weight layouts (out_features, in_features), init std=0.02.
    w1 = jax.random.normal(kw1, (hidden, n_embd), dtype=dtype) * 0.02
    w2 = jax.random.normal(kw2, (n_embd, hidden), dtype=dtype) * 0.02

    # One-time parameter prep (transpose + bf16 cast + lane-dense padding),
    # hoisted out of the per-call path.
    w1_t, w2_t = prepare_mlp_params(w1, w2)

    y = mlp_forward(x, w1_t, w2_t)
    y = jax.block_until_ready(y)

    # Reference mimicking the kernel numerics (bf16 operands, f32 accumulate).
    xb = x.reshape(-1, n_embd).astype(jnp.bfloat16).astype(jnp.float32)
    w1b = w1.T.astype(jnp.bfloat16).astype(jnp.float32)
    w2b = w2.T.astype(jnp.bfloat16).astype(jnp.float32)
    h_ref = xb @ w1b
    h_ref = h_ref * jax.nn.sigmoid(h_ref)
    h_ref = h_ref.astype(jnp.bfloat16).astype(jnp.float32)
    y_ref = (h_ref @ w2b).reshape(B, T, n_embd)

    assert y.shape == (B, T, n_embd) and y.dtype == dtype
    assert jnp.allclose(y, y_ref, atol=3e-3, rtol=2e-2), "mismatch vs reference"
    print("KERNEL_OK")
</pallas_src>

<mosaic_0001>
module attributes {stable_mosaic.version = 11 : i64} {
  func.func @_mlp_resident_kernel(%arg0: i32, %arg1: memref<16x128xf32, #tpu.memory_space<vmem>>, %arg2: memref<128x128xbf16, #tpu.memory_space<vmem>>, %arg3: memref<128x128xbf16, #tpu.memory_space<vmem>>, %arg4: memref<16x128xf32, #tpu.memory_space<vmem>>) attributes {dimension_semantics = [#tpu.dimension_semantics<parallel>], iteration_bounds = array<i64: 1>, scalar_prefetch = 0 : i64, scratch_operands = 0 : i64, tpu.core_type = #tpu.core_type<tc>, window_params = [{transform_indices = @transform_0, window_bounds = array<i64: 16, 128>}, {pipeline_mode = #tpu.pipeline_mode<synchronous>, transform_indices = @transform_1, window_bounds = array<i64: 128, 128>}, {pipeline_mode = #tpu.pipeline_mode<synchronous>, transform_indices = @transform_2, window_bounds = array<i64: 128, 128>}, {transform_indices = @transform_3, window_bounds = array<i64: 16, 128>}]} {
    %c0 = arith.constant 0 : index
    %c0_0 = arith.constant 0 : index
    %0 = vector.load %arg1[%c0, %c0_0] : memref<16x128xf32, #tpu.memory_space<vmem>>, vector<16x128xf32>
    %1 = arith.truncf %0 : vector<16x128xf32> to vector<16x128xbf16>
    %c0_1 = arith.constant 0 : index
    %c0_2 = arith.constant 0 : index
    %2 = vector.load %arg2[%c0_1, %c0_2] : memref<128x128xbf16, #tpu.memory_space<vmem>>, vector<128x128xbf16>
    %cst = arith.constant dense<0.000000e+00> : vector<16x128xf32>
    %3 = tpu.matmul %1, %2, %cst {dimension_numbers = #tpu.dot_dimension_numbers<[1], [0], [0], [1], [0, 0, 1, 1], [], []>} : vector<16x128xbf16>, vector<128x128xbf16>, vector<16x128xf32> -> vector<16x128xf32>
    %cst_3 = arith.constant 0.000000e+00 : f32
    %4 = vector.broadcast %cst_3 : f32 to vector<16x128xf32>
    %5 = arith.subf %4, %3 : vector<16x128xf32>
    %6 = math.exp %5 : vector<16x128xf32>
    %cst_4 = arith.constant 1.000000e+00 : f32
    %7 = vector.broadcast %cst_4 : f32 to vector<16x128xf32>
    %8 = arith.addf %7, %6 : vector<16x128xf32>
    %9 = tpu.reciprocal %8 {approx = true} : vector<16x128xf32> -> vector<16x128xf32>
    %10 = arith.mulf %3, %9 : vector<16x128xf32>
    %c0_5 = arith.constant 0 : index
    %c0_6 = arith.constant 0 : index
    %11 = vector.load %arg3[%c0_5, %c0_6] : memref<128x128xbf16, #tpu.memory_space<vmem>>, vector<128x128xbf16>
    %12 = arith.truncf %10 : vector<16x128xf32> to vector<16x128xbf16>
    %cst_7 = arith.constant dense<0.000000e+00> : vector<16x128xf32>
    %13 = tpu.matmul %12, %11, %cst_7 {dimension_numbers = #tpu.dot_dimension_numbers<[1], [0], [0], [1], [0, 0, 1, 1], [], []>} : vector<16x128xbf16>, vector<128x128xbf16>, vector<16x128xf32> -> vector<16x128xf32>
    %c0_8 = arith.constant 0 : index
    %c0_9 = arith.constant 0 : index
    %14 = vector.load %arg4[%c0_8, %c0_9] : memref<16x128xf32, #tpu.memory_space<vmem>>, vector<16x128xf32>
    tpu.vector_store %arg4[%c0_8, %c0_9], %13 {strides = array<i32>} : memref<16x128xf32, #tpu.memory_space<vmem>>, vector<16x128xf32>,
    return
  }
  func.func @transform_0(%arg0: i32) -> (i32, i32) {
    %c0_i32 = arith.constant 0 : i32
    %c0_i32_0 = arith.constant 0 : i32
    return %arg0, %c0_i32 : i32, i32
  }
  func.func @transform_1(%arg0: i32) -> (i32, i32) {
    %c0_i32 = arith.constant 0 : i32
    %c0_i32_0 = arith.constant 0 : i32
    %c0_i32_1 = arith.constant 0 : i32
    return %c0_i32, %c0_i32_0 : i32, i32
  }
  func.func @transform_2(%arg0: i32) -> (i32, i32) {
    %c0_i32 = arith.constant 0 : i32
    %c0_i32_0 = arith.constant 0 : i32
    %c0_i32_1 = arith.constant 0 : i32
    return %c0_i32, %c0_i32_0 : i32, i32
  }
  func.func @transform_3(%arg0: i32) -> (i32, i32) {
    %c0_i32 = arith.constant 0 : i32
    %c0_i32_0 = arith.constant 0 : i32
    return %arg0, %c0_i32 : i32, i32
  }
}

module attributes {stable_mosaic.version = 11 : i64} {
  func.func @_mlp_resident_kernel(%arg0: i32, %arg1: memref<16x128xf32, #tpu.memory_space<vmem>>, %arg2: memref<128x128xbf16, #tpu.memory_space<vmem>>, %arg3: memref<128x128xbf16, #tpu.memory_space<vmem>>, %arg4: memref<16x128xf32, #tpu.memory_space<vmem>>) attributes {dimension_semantics = [#tpu.dimension_semantics<parallel>], iteration_bounds = array<i64: 1>, scalar_prefetch = 0 : i64, scratch_operands = 0 : i64, tpu.core_type = #tpu.core_type<tc>, window_params = [{transform_indices = @transform_0, window_bounds = array<i64: 16, 128>}, {pipeline_mode = #tpu.pipeline_mode<synchronous>, transform_indices = @transform_1, window_bounds = array<i64: 128, 128>}, {pipeline_mode = #tpu.pipeline_mode<synchronous>, transform_indices = @transform_2, window_bounds = array<i64: 128, 128>}, {transform_indices = @transform_3, window_bounds = array<i64: 16, 128>}]} {
    %c0 = arith.constant 0 : index
    %c0_0 = arith.constant 0 : index
    %0 = vector.load %arg1[%c0, %c0_0] : memref<16x128xf32, #tpu.memory_space<vmem>>, vector<16x128xf32>
    %1 = arith.truncf %0 : vector<16x128xf32> to vector<16x128xbf16>
    %c0_1 = arith.constant 0 : index
    %c0_2 = arith.constant 0 : index
    %2 = vector.load %arg2[%c0_1, %c0_2] : memref<128x128xbf16, #tpu.memory_space<vmem>>, vector<128x128xbf16>
    %cst = arith.constant dense<0.000000e+00> : vector<16x128xf32>
    %3 = tpu.matmul %1, %2, %cst {dimension_numbers = #tpu.dot_dimension_numbers<[1], [0], [0], [1], [0, 0, 1, 1], [], []>} : vector<16x128xbf16>, vector<128x128xbf16>, vector<16x128xf32> -> vector<16x128xf32>
    %cst_3 = arith.constant 0.000000e+00 : f32
    %4 = vector.broadcast %cst_3 : f32 to vector<16x128xf32>
    %5 = arith.subf %4, %3 : vector<16x128xf32>
    %6 = math.exp %5 : vector<16x128xf32>
    %cst_4 = arith.constant 1.000000e+00 : f32
    %7 = vector.broadcast %cst_4 : f32 to vector<16x128xf32>
    %8 = arith.addf %7, %6 : vector<16x128xf32>
    %9 = tpu.reciprocal %8 {approx = true} : vector<16x128xf32> -> vector<16x128xf32>
    %10 = arith.mulf %3, %9 : vector<16x128xf32>
    %c0_5 = arith.constant 0 : index
    %c0_6 = arith.constant 0 : index
    %11 = vector.load %arg3[%c0_5, %c0_6] : memref<128x128xbf16, #tpu.memory_space<vmem>>, vector<128x128xbf16>
    %12 = arith.truncf %10 : vector<16x128xf32> to vector<16x128xbf16>
    %cst_7 = arith.constant dense<0.000000e+00> : vector<16x128xf32>
    %13 = tpu.matmul %12, %11, %cst_7 {dimension_numbers = #tpu.dot_dimension_numbers<[1], [0], [0], [1], [0, 0, 1, 1], [], []>} : vector<16x128xbf16>, vector<128x128xbf16>, vector<16x128xf32> -> vector<16x128xf32>
    %c0_8 = arith.constant 0 : index
    %c0_9 = arith.constant 0 : index
    %14 = vector.load %arg4[%c0_8, %c0_9] : memref<16x128xf32, #tpu.memory_space<vmem>>, vector<16x128xf32>
    tpu.vector_store %arg4[%c0_8, %c0_9], %13 {strides = array<i32>} : memref<16x128xf32, #tpu.memory_space<vmem>>, vector<16x128xf32>,
    return
  }
  func.func @transform_0(%arg0: i32) -> (i32, i32) {
    %c0_i32 = arith.constant 0 : i32
    %c0_i32_0 = arith.constant 0 : i32
    return %arg0, %c0_i32 : i32, i32
  }
  func.func @transform_1(%arg0: i32) -> (i32, i32) {
    %c0_i32 = arith.constant 0 : i32
    %c0_i32_0 = arith.constant 0 : i32
    %c0_i32_1 = arith.constant 0 : i32
    return %c0_i32, %c0_i32_0 : i32, i32
  }
  func.func @transform_2(%arg0: i32) -> (i32, i32) {
    %c0_i32 = arith.constant 0 : i32
    %c0_i32_0 = arith.constant 0 : i32
    %c0_i32_1 = arith.constant 0 : i32
    return %c0_i32, %c0_i32_0 : i32, i32
  }
  func.func @transform_3(%arg0: i32) -> (i32, i32) {
    %c0_i32 = arith.constant 0 : i32
    %c0_i32_0 = arith.constant 0 : i32
    return %arg0, %c0_i32 : i32, i32
  }
}

</mosaic_0001>

<bundles_post_ra>
// kernel: tpu_custom_call.1
= control target key start
LH: loop header
LB: loop body
LE: loop exit
PB: predicated region body
PF: predicated region fallthrough
CT: control target
= control target key end

     0   :  { %8 = vsyncpa [#allocation3], 0  ;;  %s595_s0 = inlined_call_operand.hbm [shape: f32[16,128], index: 0, kind: input, shape index: {}]   ;;  %s596_s1 = inlined_call_operand.hbm [shape: bf16[128,128], index: 1, kind: input, shape index: {}]   ;;  %s597_s2 = inlined_call_operand.hbm [shape: bf16[128,128], index: 2, kind: input, shape index: {}]   ;;  %s598_s3 = inlined_call_operand.hbm [shape: f32[16,128], index: 3, kind: output, shape index: {}]  }
   0x1   :  { %9 = vsyncpa [#allocation6], 0 }
   0x2   :  { %10 = vsyncpa [#allocation4], 0  ;;  %s505_s12 = smov [#allocation5]   ;;  %s411_s16 = scalar_lea.hbm %s596_s1, 1024 }
   0x3   :  { %s28_s13 = sshll.u32 %s505_s12, 4  ;;  %p412_p0 = scmp.ne.s32.totalorder %s596_s1, %s411_s16  ;;  %s29_s13 = int_to_ptr.vmem [resolvable:$true] %s28_s13 }
   0x4   :  { %p415_p1 = scmp.lt.u32.totalorder %s411_s16, %s596_s1 }
   0x6   :  { %p417_p2 = pnand %p415_p1, %p412_p0 }
   0x8   :  { %420 = shalt.err (!%p417_p2)
}
   0x9   :  { %s421_s21 = scalar_lea.vmem %s29_s13, 1024  ;;  %p426_p4 = scmp.lt.s32.totalorder %s29_s13, %s29_s13 }
   0xa   :  { %p422_p3 = scmp.ne.s32.totalorder %s29_s13, %s421_s21  ;;  %p427_p5 = scmp.lt.s32.totalorder %s421_s21, %s421_s21 }
   0xc   :  { %p428_p6 = por %p427_p5, %p426_p4 }
   0xe   :  { %p429_p7 = pnand %p428_p6, %p422_p3 }
  0x10   :  { %432 = shalt.err (!%p429_p7)
}
  0x11   :  { %s506_s22 = smov 64   ;;  %s507_s23 = smov 4  }
  0x12   :  { %34 = dma.hbm_to_vmem [thread:$0]  %s596_s1, 1024, %s29_s13, [#allocation6], %s506_s22, %s506_s22, %s507_s23  }
  0x13   :  { %s508_s26 = smov [#allocation2]   ;;  %s433_s30 = scalar_lea.hbm %s595_s0, 256 }
  0x14   :  { %s16_s27 = sshll.u32 %s508_s26, 4  ;;  %p434_p8 = scmp.ne.s32.totalorder %s595_s0, %s433_s30  ;;  %s17_s27 = int_to_ptr.vmem [resolvable:$true] %s16_s27 }
  0x15   :  { %p437_p9 = scmp.lt.u32.totalorder %s433_s30, %s595_s0 }
  0x17   :  { %p439_p10 = pnand %p437_p9, %p434_p8 }
  0x19   :  { %442 = shalt.err (!%p439_p10)
}
  0x1a   :  { %s443_s8 = scalar_lea.vmem %s17_s27, 256  ;;  %p448_p12 = scmp.lt.s32.totalorder %s17_s27, %s17_s27 }
  0x1b   :  { %p444_p11 = scmp.ne.s32.totalorder %s17_s27, %s443_s8  ;;  %p449_p13 = scmp.lt.s32.totalorder %s443_s8, %s443_s8 }
  0x1d   :  { %p450_p0 = por %p449_p13, %p448_p12 }
  0x1f   :  { %p451_p1 = pnand %p450_p0, %p444_p11 }
  0x21   :  { %454 = shalt.err (!%p451_p1)
}
  0x22   :  { %s509_s1 = smov 128   ;;  %s510_s9 = smov 8  }
  0x23   :  { %22 = dma.hbm_to_vmem [thread:$0]  %s595_s0, 256, %s17_s27, [#allocation3], %s509_s1, %s509_s1, %s510_s9  }
  0x24   :  { %s511_s12 = smov [#allocation7]   ;;  %s455_s16 = scalar_lea.hbm %s597_s2, 1024 }
  0x25   :  { %s40_s13 = sshll.u32 %s511_s12, 4  ;;  %p456_p2 = scmp.ne.s32.totalorder %s597_s2, %s455_s16  ;;  %s41_s13 = int_to_ptr.vmem [resolvable:$true] %s40_s13 }
  0x26   :  { %p459_p3 = scmp.lt.u32.totalorder %s455_s16, %s597_s2 }
  0x28   :  { %p461_p4 = pnand %p459_p3, %p456_p2 }
  0x2a   :  { %464 = shalt.err (!%p461_p4)
}
  0x2b   :  { %s465_s21 = scalar_lea.vmem %s41_s13, 1024  ;;  %p470_p6 = scmp.lt.s32.totalorder %s41_s13, %s41_s13 }
  0x2c   :  { %p466_p5 = scmp.ne.s32.totalorder %s41_s13, %s465_s21  ;;  %p471_p7 = scmp.lt.s32.totalorder %s465_s21, %s465_s21 }
  0x2e   :  { %p472_p8 = por %p471_p7, %p470_p6 }
  0x30   :  { %p473_p9 = pnand %p472_p8, %p466_p5 }
  0x32   :  { %476 = shalt.err (!%p473_p9)
}
  0x33   :  { %46 = dma.hbm_to_vmem [thread:$0]  %s597_s2, 1024, %s41_s13, [#allocation6], %s506_s22, %s506_s22, %s507_s23  }
  0x34   :  { %499 = dma.done.wait [#allocation3], 256  }
  0x35   :  { %500 = vsyncadd [#allocation3], 4294967040 }
  0x36   :  { %501 = dma.done.wait [#allocation6], 2048  }
  0x37   :  { %502 = vsyncadd [#allocation6], 4294965248  ;;  %v512_v0 = vmov 0.0   ;;  %vm513_vm0 = vmmov 0   ;;  %v387_v1 = vld [vmem:[#allocation5] sm:$0xff]   ;;  %v388_v2 = vld [vmem:[#allocation5 + $0x8] sm:$0xff]  }
  0x38   :  { %337 = vmatprep.subr.bf16.mxu0 %v512_v0  ;;  %353 = vmatprep.mubr.msk.bf16.mxu0 %vm513_vm0, %v512_v0  ;;  %v389_v3 = vld [vmem:[#allocation5 + $0x10] sm:$0xff]   ;;  %v390_v4 = vld [vmem:[#allocation5 + $0x18] sm:$0xff]   ;;  %v391_v5 = vld [vmem:[#allocation5 + $0x20] sm:$0xff]   ;;  %s514_s2 = smov [#allocation8]  }
  0x39   :  { %357 = vmatprep.subr.bf16.mxu1 %v512_v0  ;;  %373 = vmatprep.mubr.msk.bf16.mxu1 %vm513_vm0, %v512_v0  ;;  %v392_v6 = vld [vmem:[#allocation5 + $0x28] sm:$0xff]   ;;  %v393_v7 = vld [vmem:[#allocation5 + $0x30] sm:$0xff]   ;;  %v394_v8 = vld [vmem:[#allocation5 + $0x38] sm:$0xff]   ;;  %s290_s22 = sshll.u32 %s514_s2, 4  ;;  %s291_s22 = int_to_ptr.vmem [resolvable:$true] %s290_s22 }
  0x3a   :  { %338 = vmatpush3.bf16.msra.mxu0 %v387_v1  ;;  %v57_v9 = vld [vmem:[#allocation2] sm:$0xff]  ;;  %v58_v10 = vld [vmem:[#allocation2 + $0x8] sm:$0xff]  ;;  %v395_v12 = vld [vmem:[#allocation7] sm:$0xff]   ;;  %s477_s23 = scalar_lea.vmem %s291_s22, 256  ;;  %p482_p11 = scmp.lt.s32.totalorder %s291_s22, %s291_s22 }
  0x3b   :  { %339 = vmatprep.subr.bf16.mxu0 %v512_v0  ;;  %v59_v11 = vpack.c.bf16 %v58_v10, %v57_v9  ;;  %358 = vmatpush3.bf16.msra.mxu1 %v395_v12  ;;  %v396_v13 = vld [vmem:[#allocation7 + $0x8] sm:$0xff]   ;;  %v397_v14 = vld [vmem:[#allocation7 + $0x10] sm:$0xff]   ;;  %v398_v15 = vld [vmem:[#allocation7 + $0x18] sm:$0xff]   ;;  %p478_p10 = scmp.ne.s32.totalorder %s291_s22, %s477_s23  ;;  %p483_p12 = scmp.lt.s32.totalorder %s477_s23, %s477_s23 }
  0x3c   :  { %359 = vmatprep.subr.bf16.mxu1 %v512_v0  ;;  %v399_v16 = vld [vmem:[#allocation7 + $0x20] sm:$0xff]   ;;  %v400_v17 = vld [vmem:[#allocation7 + $0x28] sm:$0xff]   ;;  %v401_v18 = vld [vmem:[#allocation7 + $0x30] sm:$0xff]  }
  0x3d   :  { %v402_v19 = vld [vmem:[#allocation7 + $0x38] sm:$0xff]   ;;  %p484_p13 = por %p483_p12, %p482_p11 }
  0x3e   :  { %340 = vmatpush3.bf16.msra.mxu0 %v388_v2 }
  0x3f   :  { %341 = vmatprep.subr.bf16.mxu0 %v512_v0  ;;  %360 = vmatpush3.bf16.msra.mxu1 %v396_v13  ;;  %p485_p0 = pnand %p484_p13, %p478_p10 }
  0x40   :  { %361 = vmatprep.subr.bf16.mxu1 %v512_v0 }
  0x42   :  { %342 = vmatpush3.bf16.msra.mxu0 %v389_v3 }
  0x43   :  { %343 = vmatprep.subr.bf16.mxu0 %v512_v0  ;;  %362 = vmatpush3.bf16.msra.mxu1 %v397_v14 }
  0x44   :  { %363 = vmatprep.subr.bf16.mxu1 %v512_v0 }
  0x46   :  { %344 = vmatpush3.bf16.msra.mxu0 %v390_v4 }
  0x47   :  { %345 = vmatprep.subr.bf16.mxu0 %v512_v0  ;;  %364 = vmatpush3.bf16.msra.mxu1 %v398_v15 }
  0x48   :  { %365 = vmatprep.subr.bf16.mxu1 %v512_v0 }
  0x4a   :  { %346 = vmatpush3.bf16.msra.mxu0 %v391_v5 }
  0x4b   :  { %347 = vmatprep.subr.bf16.mxu0 %v512_v0  ;;  %366 = vmatpush3.bf16.msra.mxu1 %v399_v16 }
  0x4c   :  { %367 = vmatprep.subr.bf16.mxu1 %v512_v0 }
  0x4e   :  { %348 = vmatpush3.bf16.msra.mxu0 %v392_v6 }
  0x4f   :  { %349 = vmatprep.subr.bf16.mxu0 %v512_v0  ;;  %368 = vmatpush3.bf16.msra.mxu1 %v400_v17 }
  0x50   :  { %369 = vmatprep.subr.bf16.mxu1 %v512_v0 }
  0x52   :  { %350 = vmatpush3.bf16.msra.mxu0 %v393_v7 }
  0x53   :  { %351 = vmatprep.subr.bf16.mxu0 %v512_v0  ;;  %370 = vmatpush3.bf16.msra.mxu1 %v401_v18 }
  0x54   :  { %371 = vmatprep.subr.bf16.mxu1 %v512_v0 }
  0x56   :  { %352 = vmatpush3.bf16.msra.mxu0 %v394_v8 }
  0x57   :  { %372 = vmatpush3.bf16.msra.mxu1 %v402_v19 }
  0x59   :  { %354 = vmatmul.mubr.bf16.vlgmr.msra.gmra.mrb[0].mxu0 %v59_v11 }
 0x12c   :  { %v158_v20 = vpop.f32.mrb[0].mxu0 }
 0x12d   :  { %v165_v21 = vsub.f32 0.0, %v158_v20  ;;  %v355_v22 = vpop.f32.mrb[1].mxu0 }
 0x12e   :  { %v161_v23 = vpop.f32.mrb[2].mxu0 }
 0x12f   :  { %v167_v24 = vmul.f32 1.442695, %v165_v21  ;;  %v166_v25 = vsub.f32 0.0, %v161_v23  ;;  %v356_v26 = vpop.f32.mrb[3].mxu0 }
 0x131   :  { %403 = vpow2.f32 %v167_v24  ;;  %v169_v27 = vmul.f32 1.442695, %v166_v25 }
 0x133   :  { %405 = vpow2.f32 %v169_v27 }
 0x13b   :  { %v404_v28 = vpop.eup %403 }
 0x13c   :  { %v171_v29 = vadd.f32 1.0, %v404_v28 }
 0x13d   :  { %v406_v30 = vpop.eup %405 }
 0x13e   :  { %407 = vrcp.f32 %v171_v29  ;;  %v172_v31 = vadd.f32 1.0, %v406_v30 }
 0x140   :  { %409 = vrcp.f32 %v172_v31 }
 0x148   :  { %v408_v32 = vpop.eup %407 }
 0x149   :  { %v175_v34 = vmul.f32 %v408_v32, %v158_v20 }
 0x14a   :  { %v410_v33 = vpop.eup %409 }
 0x14b   :  { %v176_v35 = vmul.f32 %v410_v33, %v161_v23 }
 0x14d   :  { %v193_v36 = vpack.c.bf16 %v176_v35, %v175_v34 }
 0x14f   :  { %374 = vmatmul.mubr.bf16.vlgmr.msra.gmra.mrb[0].mxu1 %v193_v36 }
 0x222   :  { %v276_v37 = vpop.f32.mrb[0].mxu1 }
 0x223   :  { %283 = vst [vmem:[#allocation8] sm:$0xff] %v276_v37  ;;  %v375_v38 = vpop.f32.mrb[1].mxu1 }
 0x224   :  { %v279_v39 = vpop.f32.mrb[2].mxu1 }
 0x225   :  { %284 = vst [vmem:[#allocation8 + $0x8] sm:$0xff] %v279_v39  ;;  %v376_v40 = vpop.f32.mrb[3].mxu1 }
 0x226   :  { %488 = shalt.err (!%p485_p0)
}
 0x227   :  { %s489_s27 = scalar_lea.hbm %s598_s3, 256 }
 0x228   :  { %p490_p1 = scmp.ne.s32.totalorder %s598_s3, %s489_s27  ;;  %p493_p2 = scmp.lt.u32.totalorder %s489_s27, %s598_s3 }
 0x22a   :  { %p495_p3 = pnand %p493_p2, %p490_p1 }
 0x22c   :  { %498 = shalt.err (!%p495_p3)
}
 0x22d   :  { %296 = dma.vmem_to_hbm [thread:$0]  %s291_s22, 256, %s598_s3, [#allocation4], %s509_s1, %s509_s1, %s510_s9  }
 0x22e   :  { %503 = dma.done.wait [#allocation4], 256  }
 0x22f   :  { %504 = vsyncadd [#allocation4], 4294967040 }
 0x230   :  { %300 = vsyncpa [#allocation3], 1 }
 0x231   :  { %301 = vsyncpa [#allocation6], 1 }
 0x232   :  { %302 = vsyncpa [#allocation4], 1 }

// kernel: tpu_custom_call.1
= control target key start
LH: loop header
LB: loop body
LE: loop exit
PB: predicated region body
PF: predicated region fallthrough
CT: control target
= control target key end

     0   :  { %8 = vsyncpa [#allocation3], 0  ;;  %s595_s0 = inlined_call_operand.hbm [shape: f32[16,128], index: 0, kind: input, shape index: {}]   ;;  %s596_s1 = inlined_call_operand.hbm [shape: bf16[128,128], index: 1, kind: input, shape index: {}]   ;;  %s597_s2 = inlined_call_operand.hbm [shape: bf16[128,128], index: 2, kind: input, shape index: {}]   ;;  %s598_s3 = inlined_call_operand.hbm [shape: f32[16,128], index: 3, kind: output, shape index: {}]  }
   0x1   :  { %9 = vsyncpa [#allocation6], 0 }
   0x2   :  { %10 = vsyncpa [#allocation4], 0  ;;  %s505_s12 = smov [#allocation5]   ;;  %s411_s16 = scalar_lea.hbm %s596_s1, 1024 }
   0x3   :  { %s28_s13 = sshll.u32 %s505_s12, 4  ;;  %p412_p0 = scmp.ne.s32.totalorder %s596_s1, %s411_s16  ;;  %s29_s13 = int_to_ptr.vmem [resolvable:$true] %s28_s13 }
   0x4   :  { %p415_p1 = scmp.lt.u32.totalorder %s411_s16, %s596_s1 }
   0x6   :  { %p417_p2 = pnand %p415_p1, %p412_p0 }
   0x8   :  { %420 = shalt.err (!%p417_p2)
}
   0x9   :  { %s421_s21 = scalar_lea.vmem %s29_s13, 1024  ;;  %p426_p4 = scmp.lt.s32.totalorder %s29_s13, %s29_s13 }
   0xa   :  { %p422_p3 = scmp.ne.s32.totalorder %s29_s13, %s421_s21  ;;  %p427_p5 = scmp.lt.s32.totalorder %s421_s21, %s421_s21 }
   0xc   :  { %p428_p6 = por %p427_p5, %p426_p4 }
   0xe   :  { %p429_p7 = pnand %p428_p6, %p422_p3 }
  0x10   :  { %432 = shalt.err (!%p429_p7)
}
  0x11   :  { %s506_s22 = smov 64   ;;  %s507_s23 = smov 4  }
  0x12   :  { %34 = dma.hbm_to_vmem [thread:$0]  %s596_s1, 1024, %s29_s13, [#allocation6], %s506_s22, %s506_s22, %s507_s23  }
  0x13   :  { %s508_s26 = smov [#allocation2]   ;;  %s433_s30 = scalar_lea.hbm %s595_s0, 256 }
  0x14   :  { %s16_s27 = sshll.u32 %s508_s26, 4  ;;  %p434_p8 = scmp.ne.s32.totalorder %s595_s0, %s433_s30  ;;  %s17_s27 = int_to_ptr.vmem [resolvable:$true] %s16_s27 }
  0x15   :  { %p437_p9 = scmp.lt.u32.totalorder %s433_s30, %s595_s0 }
  0x17   :  { %p439_p10 = pnand %p437_p9, %p434_p8 }
  0x19   :  { %442 = shalt.err (!%p439_p10)
}
  0x1a   :  { %s443_s8 = scalar_lea.vmem %s17_s27, 256  ;;  %p448_p12 = scmp.lt.s32.totalorder %s17_s27, %s17_s27 }
  0x1b   :  { %p444_p11 = scmp.ne.s32.totalorder %s17_s27, %s443_s8  ;;  %p449_p13 = scmp.lt.s32.totalorder %s443_s8, %s443_s8 }
  0x1d   :  { %p450_p0 = por %p449_p13, %p448_p12 }
  0x1f   :  { %p451_p1 = pnand %p450_p0, %p444_p11 }
  0x21   :  { %454 = shalt.err (!%p451_p1)
}
  0x22   :  { %s509_s1 = smov 128   ;;  %s510_s9 = smov 8  }
  0x23   :  { %22 = dma.hbm_to_vmem [thread:$0]  %s595_s0, 256, %s17_s27, [#allocation3], %s509_s1, %s509_s1, %s510_s9  }
  0x24   :  { %s511_s12 = smov [#allocation7]   ;;  %s455_s16 = scalar_lea.hbm %s597_s2, 1024 }
  0x25   :  { %s40_s13 = sshll.u32 %s511_s12, 4  ;;  %p456_p2 = scmp.ne.s32.totalorder %s597_s2, %s455_s16  ;;  %s41_s13 = int_to_ptr.vmem [resolvable:$true] %s40_s13 }
  0x26   :  { %p459_p3 = scmp.lt.u32.totalorder %s455_s16, %s597_s2 }
  0x28   :  { %p461_p4 = pnand %p459_p3, %p456_p2 }
  0x2a   :  { %464 = shalt.err (!%p461_p4)
}
  0x2b   :  { %s465_s21 = scalar_lea.vmem %s41_s13, 1024  ;;  %p470_p6 = scmp.lt.s32.totalorder %s41_s13, %s41_s13 }
  0x2c   :  { %p466_p5 = scmp.ne.s32.totalorder %s41_s13, %s465_s21  ;;  %p471_p7 = scmp.lt.s32.totalorder %s465_s21, %s465_s21 }
  0x2e   :  { %p472_p8 = por %p471_p7, %p470_p6 }
  0x30   :  { %p473_p9 = pnand %p472_p8, %p466_p5 }
  0x32   :  { %476 = shalt.err (!%p473_p9)
}
  0x33   :  { %46 = dma.hbm_to_vmem [thread:$0]  %s597_s2, 1024, %s41_s13, [#allocation6], %s506_s22, %s506_s22, %s507_s23  }
  0x34   :  { %499 = dma.done.wait [#allocation3], 256  }
  0x35   :  { %500 = vsyncadd [#allocation3], 4294967040 }
  0x36   :  { %501 = dma.done.wait [#allocation6], 2048  }
  0x37   :  { %502 = vsyncadd [#allocation6], 4294965248  ;;  %v512_v0 = vmov 0.0   ;;  %vm513_vm0 = vmmov 0   ;;  %v387_v1 = vld [vmem:[#allocation5] sm:$0xff]   ;;  %v388_v2 = vld [vmem:[#allocation5 + $0x8] sm:$0xff]  }
  0x38   :  { %337 = vmatprep.subr.bf16.mxu0 %v512_v0  ;;  %353 = vmatprep.mubr.msk.bf16.mxu0 %vm513_vm0, %v512_v0  ;;  %v389_v3 = vld [vmem:[#allocation5 + $0x10] sm:$0xff]   ;;  %v390_v4 = vld [vmem:[#allocation5 + $0x18] sm:$0xff]   ;;  %v391_v5 = vld [vmem:[#allocation5 + $0x20] sm:$0xff]   ;;  %s514_s2 = smov [#allocation8]  }
  0x39   :  { %357 = vmatprep.subr.bf16.mxu1 %v512_v0  ;;  %373 = vmatprep.mubr.msk.bf16.mxu1 %vm513_vm0, %v512_v0  ;;  %v392_v6 = vld [vmem:[#allocation5 + $0x28] sm:$0xff]   ;;  %v393_v7 = vld [vmem:[#allocation5 + $0x30] sm:$0xff]   ;;  %v394_v8 = vld [vmem:[#allocation5 + $0x38] sm:$0xff]   ;;  %s290_s22 = sshll.u32 %s514_s2, 4  ;;  %s291_s22 = int_to_ptr.vmem [resolvable:$true] %s290_s22 }
  0x3a   :  { %338 = vmatpush3.bf16.msra.mxu0 %v387_v1  ;;  %v57_v9 = vld [vmem:[#allocation2] sm:$0xff]  ;;  %v58_v10 = vld [vmem:[#allocation2 + $0x8] sm:$0xff]  ;;  %v395_v12 = vld [vmem:[#allocation7] sm:$0xff]   ;;  %s477_s23 = scalar_lea.vmem %s291_s22, 256  ;;  %p482_p11 = scmp.lt.s32.totalorder %s291_s22, %s291_s22 }
  0x3b   :  { %339 = vmatprep.subr.bf16.mxu0 %v512_v0  ;;  %v59_v11 = vpack.c.bf16 %v58_v10, %v57_v9  ;;  %358 = vmatpush3.bf16.msra.mxu1 %v395_v12  ;;  %v396_v13 = vld [vmem:[#allocation7 + $0x8] sm:$0xff]   ;;  %v397_v14 = vld [vmem:[#allocation7 + $0x10] sm:$0xff]   ;;  %v398_v15 = vld [vmem:[#allocation7 + $0x18] sm:$0xff]   ;;  %p478_p10 = scmp.ne.s32.totalorder %s291_s22, %s477_s23  ;;  %p483_p12 = scmp.lt.s32.totalorder %s477_s23, %s477_s23 }
  0x3c   :  { %359 = vmatprep.subr.bf16.mxu1 %v512_v0  ;;  %v399_v16 = vld [vmem:[#allocation7 + $0x20] sm:$0xff]   ;;  %v400_v17 = vld [vmem:[#allocation7 + $0x28] sm:$0xff]   ;;  %v401_v18 = vld [vmem:[#allocation7 + $0x30] sm:$0xff]  }
  0x3d   :  { %v402_v19 = vld [vmem:[#allocation7 + $0x38] sm:$0xff]   ;;  %p484_p13 = por %p483_p12, %p482_p11 }
  0x3e   :  { %340 = vmatpush3.bf16.msra.mxu0 %v388_v2 }
  0x3f   :  { %341 = vmatprep.subr.bf16.mxu0 %v512_v0  ;;  %360 = vmatpush3.bf16.msra.mxu1 %v396_v13  ;;  %p485_p0 = pnand %p484_p13, %p478_p10 }
  0x40   :  { %361 = vmatprep.subr.bf16.mxu1 %v512_v0 }
  0x42   :  { %342 = vmatpush3.bf16.msra.mxu0 %v389_v3 }
  0x43   :  { %343 = vmatprep.subr.bf16.mxu0 %v512_v0  ;;  %362 = vmatpush3.bf16.msra.mxu1 %v397_v14 }
  0x44   :  { %363 = vmatprep.subr.bf16.mxu1 %v512_v0 }
  0x46   :  { %344 = vmatpush3.bf16.msra.mxu0 %v390_v4 }
  0x47   :  { %345 = vmatprep.subr.bf16.mxu0 %v512_v0  ;;  %364 = vmatpush3.bf16.msra.mxu1 %v398_v15 }
  0x48   :  { %365 = vmatprep.subr.bf16.mxu1 %v512_v0 }
  0x4a   :  { %346 = vmatpush3.bf16.msra.mxu0 %v391_v5 }
  0x4b   :  { %347 = vmatprep.subr.bf16.mxu0 %v512_v0  ;;  %366 = vmatpush3.bf16.msra.mxu1 %v399_v16 }
  0x4c   :  { %367 = vmatprep.subr.bf16.mxu1 %v512_v0 }
  0x4e   :  { %348 = vmatpush3.bf16.msra.mxu0 %v392_v6 }
  0x4f   :  { %349 = vmatprep.subr.bf16.mxu0 %v512_v0  ;;  %368 = vmatpush3.bf16.msra.mxu1 %v400_v17 }
  0x50   :  { %369 = vmatprep.subr.bf16.mxu1 %v512_v0 }
  0x52   :  { %350 = vmatpush3.bf16.msra.mxu0 %v393_v7 }
  0x53   :  { %351 = vmatprep.subr.bf16.mxu0 %v512_v0  ;;  %370 = vmatpush3.bf16.msra.mxu1 %v401_v18 }
  0x54   :  { %371 = vmatprep.subr.bf16.mxu1 %v512_v0 }
  0x56   :  { %352 = vmatpush3.bf16.msra.mxu0 %v394_v8 }
  0x57   :  { %372 = vmatpush3.bf16.msra.mxu1 %v402_v19 }
  0x59   :  { %354 = vmatmul.mubr.bf16.vlgmr.msra.gmra.mrb[0].mxu0 %v59_v11 }
 0x12c   :  { %v158_v20 = vpop.f32.mrb[0].mxu0 }
 0x12d   :  { %v165_v21 = vsub.f32 0.0, %v158_v20  ;;  %v355_v22 = vpop.f32.mrb[1].mxu0 }
 0x12e   :  { %v161_v23 = vpop.f32.mrb[2].mxu0 }
 0x12f   :  { %v167_v24 = vmul.f32 1.442695, %v165_v21  ;;  %v166_v25 = vsub.f32 0.0, %v161_v23  ;;  %v356_v26 = vpop.f32.mrb[3].mxu0 }
 0x131   :  { %403 = vpow2.f32 %v167_v24  ;;  %v169_v27 = vmul.f32 1.442695, %v166_v25 }
 0x133   :  { %405 = vpow2.f32 %v169_v27 }
 0x13b   :  { %v404_v28 = vpop.eup %403 }
 0x13c   :  { %v171_v29 = vadd.f32 1.0, %v404_v28 }
 0x13d   :  { %v406_v30 = vpop.eup %405 }
 0x13e   :  { %407 = vrcp.f32 %v171_v29  ;;  %v172_v31 = vadd.f32 1.0, %v406_v30 }
 0x140   :  { %409 = vrcp.f32 %v172_v31 }
 0x148   :  { %v408_v32 = vpop.eup %407 }
 0x149   :  { %v175_v34 = vmul.f32 %v408_v32, %v158_v20 }
 0x14a   :  { %v410_v33 = vpop.eup %409 }
 0x14b   :  { %v176_v35 = vmul.f32 %v410_v33, %v161_v23 }
 0x14d   :  { %v193_v36 = vpack.c.bf16 %v176_v35, %v175_v34 }
 0x14f   :  { %374 = vmatmul.mubr.bf16.vlgmr.msra.gmra.mrb[0].mxu1 %v193_v36 }
 0x222   :  { %v276_v37 = vpop.f32.mrb[0].mxu1 }
 0x223   :  { %283 = vst [vmem:[#allocation8] sm:$0xff] %v276_v37  ;;  %v375_v38 = vpop.f32.mrb[1].mxu1 }
 0x224   :  { %v279_v39 = vpop.f32.mrb[2].mxu1 }
 0x225   :  { %284 = vst [vmem:[#allocation8 + $0x8] sm:$0xff] %v279_v39  ;;  %v376_v40 = vpop.f32.mrb[3].mxu1 }
 0x226   :  { %488 = shalt.err (!%p485_p0)
}
 0x227   :  { %s489_s27 = scalar_lea.hbm %s598_s3, 256 }
 0x228   :  { %p490_p1 = scmp.ne.s32.totalorder %s598_s3, %s489_s27  ;;  %p493_p2 = scmp.lt.u32.totalorder %s489_s27, %s598_s3 }
 0x22a   :  { %p495_p3 = pnand %p493_p2, %p490_p1 }
 0x22c   :  { %498 = shalt.err (!%p495_p3)
}
 0x22d   :  { %296 = dma.vmem_to_hbm [thread:$0]  %s291_s22, 256, %s598_s3, [#allocation4], %s509_s1, %s509_s1, %s510_s9  }
 0x22e   :  { %503 = dma.done.wait [#allocation4], 256  }
 0x22f   :  { %504 = vsyncadd [#allocation4], 4294967040 }
 0x230   :  { %300 = vsyncpa [#allocation3], 1 }
 0x231   :  { %301 = vsyncpa [#allocation6], 1 }
 0x232   :  { %302 = vsyncpa [#allocation4], 1 }

</bundles_post_ra>
